<compile_context>
chip_gen: v7x
topology: tpu7x:2x2x1
jax: 0.10.0
libtpu: 0.0.40
codegen_flags: <defaults>
</compile_context>

<pallas_src>
import functools

import jax
import jax.numpy as jnp
from jax.experimental import pallas as pl
from jax.experimental.pallas import tpu as pltpu


def _round_up(x: int, m: int) -> int:
    return ((x + m - 1) // m) * m


# --------------------------------------------------------------------------
# Kernels
# --------------------------------------------------------------------------
def _fused_kernel(src_ref, dst_ref, rid_ref, z_ref, rel_ref, out_ref, *,
                  apply_sigmoid):
    """Fully fused path: z and rel are VMEM-resident; gathers done in-kernel.

    src_ref/dst_ref/rid_ref : (TE, 1) int32 per-tile edge indices
    z_ref                   : (N_pad, C_pad) node embeddings (resident)
    rel_ref                 : (R_pad, C_pad) relation diagonals (resident)
    out_ref                 : (1, TE) per-tile scores (lane-dense)
    """
    z = z_ref[...].astype(jnp.float32)       # (N_pad, C_pad)
    rel = rel_ref[...].astype(jnp.float32)   # (R_pad, C_pad)
    src = src_ref[...]                       # (TE, 1) int32
    dst = dst_ref[...]
    rid = rid_ref[...]

    te = src.shape[0]
    n_pad = z.shape[0]
    r_pad = rel.shape[0]

    # Exact one-hot row gathers on the MXU (f32: multiply-by-1/add-0 is exact).
    node_iota = jax.lax.broadcasted_iota(jnp.int32, (te, n_pad), 1)
    rel_iota = jax.lax.broadcasted_iota(jnp.int32, (te, r_pad), 1)
    oh_src = (node_iota == src).astype(jnp.float32)   # (TE, N_pad)
    oh_dst = (node_iota == dst).astype(jnp.float32)
    oh_rel = (rel_iota == rid).astype(jnp.float32)    # (TE, R_pad)

    z_src = jnp.dot(oh_src, z, preferred_element_type=jnp.float32)   # (TE, C)
    z_dst = jnp.dot(oh_dst, z, preferred_element_type=jnp.float32)
    r = jnp.dot(oh_rel, rel, preferred_element_type=jnp.float32)

    res = jnp.sum(z_src * r * z_dst, axis=1)          # (TE,)
    if apply_sigmoid:
        res = jax.nn.sigmoid(res)
    out_ref[...] = res[None, :].astype(out_ref.dtype)  # lane-dense (1, TE)


def _tiled_kernel(zsrc_ref, zdst_ref, rid_ref, rel_ref, out_ref, *,
                  apply_sigmoid):
    """Fallback path (large node table): z rows gathered by XLA, rel fused.

    zsrc_ref/zdst_ref : (TE, C_pad) gathered node rows for this tile
    rid_ref           : (TE, 1) int32
    rel_ref           : (R_pad, C_pad) resident relation diagonals
    out_ref           : (1, TE)
    """
    zs = zsrc_ref[...].astype(jnp.float32)
    zd = zdst_ref[...].astype(jnp.float32)
    rel = rel_ref[...].astype(jnp.float32)
    rid = rid_ref[...]                        # (TE, 1)

    te = zs.shape[0]
    r_pad = rel.shape[0]

    rel_iota = jax.lax.broadcasted_iota(jnp.int32, (te, r_pad), 1)
    oh_rel = (rel_iota == rid).astype(jnp.float32)
    r = jnp.dot(oh_rel, rel, preferred_element_type=jnp.float32)  # (TE, C_pad)

    res = jnp.sum(zs * r * zd, axis=1)        # (TE,)
    if apply_sigmoid:
        res = jax.nn.sigmoid(res)
    out_ref[...] = res[None, :].astype(out_ref.dtype)


# --------------------------------------------------------------------------
# Wrapper
# --------------------------------------------------------------------------
def rel_decoder_forward(z, rel, edge_index, rel_id, sigmoid=True):
    """DistMult decoder forward.

    z          : [N, C] float node embeddings (f32 or bf16)
    rel        : [R, C] float relation diagonals
    edge_index : [2, E] int (src row, dst row)
    rel_id     : [E]    int relation type per edge
    returns    : [E] float scores (sigmoid'd by default), dtype of z
    """
    N, C = z.shape
    R = rel.shape[0]
    E = edge_index.shape[1]

    # Lane / sublane-dense padding.
    c_pad = _round_up(max(C, 1), 128)
    n_pad = _round_up(max(N, 1), 8)
    r_pad = _round_up(max(R, 1), 8)

    zp = jnp.pad(z, ((0, n_pad - N), (0, c_pad - C)))
    relp = jnp.pad(rel, ((0, r_pad - R), (0, c_pad - C)))

    in_bytes = jnp.dtype(z.dtype).itemsize
    out_dtype = z.dtype

    # Fuse the node gathers in-kernel only when the node table comfortably
    # fits in VMEM (typical for GNN decoders).  Otherwise z rows are gathered
    # by XLA and the kernel still runs grid-tiled with the rel gather fused.
    fuse = (n_pad <= 1024
            and n_pad * c_pad * 4 <= (4 << 20)
            and r_pad * c_pad * 4 <= (2 << 20))

    # Edge-tile size: multiple of 128 lanes; modest so per-tile VMEM stays
    # well under the v7x 64 MiB (32 MiB scoped) budget.
    te = min(512 if fuse else 1024, _round_up(max(E, 1), 128))
    e_pad = _round_up(max(E, 1), te)
    grid = (e_pad // te,)

    def pad_idx(v):
        v = v.astype(jnp.int32)
        return jnp.pad(v, (0, e_pad - E)).reshape(e_pad, 1)

    src = pad_idx(edge_index[0])
    dst = pad_idx(edge_index[1])
    rid = pad_idx(rel_id)

    idx_spec = pl.BlockSpec((te, 1), lambda i: (i, 0))
    out_spec = pl.BlockSpec((1, te), lambda i: (0, i))     # lane-dense output
    rel_spec = pl.BlockSpec((r_pad, c_pad), lambda i: (0, 0))
    out_shape = jax.ShapeDtypeStruct((1, e_pad), out_dtype)
    out_bytes = jnp.dtype(out_dtype).itemsize

    if fuse:
        vmem_est = (
            2 * n_pad * c_pad * in_bytes           # resident z (+ buffer slack)
            + 2 * r_pad * c_pad * in_bytes         # resident rel
            + 3 * 2 * te * 4                       # double-buffered index tiles
            + 2 * te * out_bytes                   # output tiles
            + 2 * te * n_pad * 4 + te * r_pad * 4  # one-hot intermediates
            + 3 * te * c_pad * 4                   # gathered f32 tiles
            + (4 << 20)                            # headroom
        )
        kernel = functools.partial(_fused_kernel, apply_sigmoid=sigmoid)
        out = pl.pallas_call(
            kernel,
            out_shape=out_shape,
            grid=grid,
            in_specs=[
                idx_spec, idx_spec, idx_spec,
                pl.BlockSpec((n_pad, c_pad), lambda i: (0, 0)),   # z resident
                rel_spec,                                         # rel resident
            ],
            out_specs=out_spec,
            compiler_params=pltpu.CompilerParams(
                dimension_semantics=("parallel",),
                vmem_limit_bytes=int(min(max(vmem_est, 16 << 20), 64 << 20)),
            ),
        )(src, dst, rid, zp, relp)
    else:
        # Large node table: row-gather z in XLA (no robust vectorized dynamic
        # row-gather primitive in Pallas TPU for HBM-sized tables), then run
        # the grid-tiled kernel with the rel gather fused.
        src_i = edge_index[0].astype(jnp.int32)
        dst_i = edge_index[1].astype(jnp.int32)
        z_src = jnp.pad(jnp.take(zp, src_i, axis=0), ((0, e_pad - E), (0, 0)))
        z_dst = jnp.pad(jnp.take(zp, dst_i, axis=0), ((0, e_pad - E), (0, 0)))
        ztile_spec = pl.BlockSpec((te, c_pad), lambda i: (i, 0))

        vmem_est = (
            2 * 2 * te * c_pad * in_bytes          # double-buffered z tiles
            + 2 * r_pad * c_pad * in_bytes
            + 2 * te * 4
            + 2 * te * out_bytes
            + te * r_pad * 4
            + 3 * te * c_pad * 4
            + (4 << 20)
        )
        kernel = functools.partial(_tiled_kernel, apply_sigmoid=sigmoid)
        out = pl.pallas_call(
            kernel,
            out_shape=out_shape,
            grid=grid,
            in_specs=[ztile_spec, ztile_spec, idx_spec, rel_spec],
            out_specs=out_spec,
            compiler_params=pltpu.CompilerParams(
                dimension_semantics=("parallel",),
                vmem_limit_bytes=int(min(max(vmem_est, 16 << 20), 64 << 20)),
            ),
        )(z_src, z_dst, rid, relp)

    return out[0, :E]


class RelDecoderPallas:
    """Mirror of the PyTorch RelDecoder module (forward only)."""

    def __init__(self, in_channels, rel_types):
        self.in_channels = in_channels
        self.rel_types = rel_types
        # Matches nn.Parameter(torch.ones((rel_types, in_channels))).
        self.rel = jnp.ones((rel_types, in_channels), dtype=jnp.float32)

    def __call__(self, z, edge_index, rel_id, sigmoid=True):
        return rel_decoder_forward(z, self.rel, edge_index, rel_id,
                                   sigmoid=sigmoid)


def _reference(z, rel, edge_index, rel_id, sigmoid=True):
    res = (z[edge_index[0]] * rel[rel_id] * z[edge_index[1]]).sum(axis=1)
    return jax.nn.sigmoid(res) if sigmoid else res


if __name__ == "__main__":
    key = jax.random.PRNGKey(0)
    k_z, k_src, k_dst, k_rel, k_z2 = jax.random.split(key, 5)

    N, C = 16, 32      # nodes, embedding channels
    R = 4              # relation types
    E = 8              # edges

    z = jax.random.normal(k_z, (N, C), dtype=jnp.float32)
    src = jax.random.randint(k_src, (E,), 0, N, dtype=jnp.int32)
    dst = jax.random.randint(k_dst, (E,), 0, N, dtype=jnp.int32)
    edge_index = jnp.stack([src, dst], axis=0)          # [2, E]
    rel_id = jax.random.randint(k_rel, (E,), 0, R, dtype=jnp.int32)

    decoder = RelDecoderPallas(in_channels=C, rel_types=R)

    # --- fused path (small node table), sigmoid=True ---
    out = jax.block_until_ready(decoder(z, edge_index, rel_id, sigmoid=True))
    ref = _reference(z, decoder.rel, edge_index, rel_id, sigmoid=True)
    assert out.shape == (E,)
    assert jnp.allclose(out, ref, atol=1e-5, rtol=1e-5)

    # --- fused path, sigmoid=False ---
    out_raw = jax.block_until_ready(decoder(z, edge_index, rel_id, sigmoid=False))
    ref_raw = _reference(z, decoder.rel, edge_index, rel_id, sigmoid=False)
    assert jnp.allclose(out_raw, ref_raw, atol=1e-5, rtol=1e-5)

    # --- bf16 inputs (HBM traffic halved; upcast to f32 inside the kernel) ---
    z_bf16 = z.astype(jnp.bfloat16)
    out_bf16 = jax.block_until_ready(decoder(z_bf16, edge_index, rel_id, sigmoid=True))
    ref_bf16 = _reference(z_bf16.astype(jnp.float32), decoder.rel, edge_index,
                          rel_id, sigmoid=True)
    assert out_bf16.dtype == jnp.bfloat16
    assert jnp.allclose(out_bf16.astype(jnp.float32), ref_bf16, atol=2e-2, rtol=2e-2)

    # --- fallback path (large node table -> XLA z-gather + tiled kernel) ---
    N_big = 1040
    z_big = jax.random.normal(k_z2, (N_big, C), dtype=jnp.float32)
    src_b = jax.random.randint(k_src, (E,), 0, N_big, dtype=jnp.int32)
    dst_b = jax.random.randint(k_dst, (E,), 0, N_big, dtype=jnp.int32)
    edge_index_b = jnp.stack([src_b, dst_b], axis=0)
    out_big = jax.block_until_ready(decoder(z_big, edge_index_b, rel_id, sigmoid=True))
    ref_big = _reference(z_big, decoder.rel, edge_index_b, rel_id, sigmoid=True)
    assert jnp.allclose(out_big, ref_big, atol=1e-5, rtol=1e-5)

    print("KERNEL_OK")
</pallas_src>

<mosaic_0001>
module attributes {stable_mosaic.version = 11 : i64} {
  func.func @_fused_kernel(%arg0: i32, %arg1: memref<128x1xi32, #tpu.memory_space<vmem>>, %arg2: memref<128x1xi32, #tpu.memory_space<vmem>>, %arg3: memref<128x1xi32, #tpu.memory_space<vmem>>, %arg4: memref<16x128xf32, #tpu.memory_space<vmem>>, %arg5: memref<8x128xf32, #tpu.memory_space<vmem>>, %arg6: memref<1x128xf32, #tpu.memory_space<vmem>>) attributes {dimension_semantics = [#tpu.dimension_semantics<parallel>], iteration_bounds = array<i64: 1>, scalar_prefetch = 0 : i64, scratch_operands = 0 : i64, tpu.core_type = #tpu.core_type<tc>, window_params = [{transform_indices = @transform_0, window_bounds = array<i64: 128, 1>}, {transform_indices = @transform_1, window_bounds = array<i64: 128, 1>}, {transform_indices = @transform_2, window_bounds = array<i64: 128, 1>}, {pipeline_mode = #tpu.pipeline_mode<synchronous>, transform_indices = @transform_3, window_bounds = array<i64: 16, 128>}, {pipeline_mode = #tpu.pipeline_mode<synchronous>, transform_indices = @transform_4, window_bounds = array<i64: 8, 128>}, {transform_indices = @transform_5, window_bounds = array<i64: 1, 128>}]} {
    %c0 = arith.constant 0 : index
    %c0_0 = arith.constant 0 : index
    %0 = vector.load %arg4[%c0, %c0_0] : memref<16x128xf32, #tpu.memory_space<vmem>>, vector<16x128xf32>
    %c0_1 = arith.constant 0 : index
    %c0_2 = arith.constant 0 : index
    %1 = vector.load %arg5[%c0_1, %c0_2] : memref<8x128xf32, #tpu.memory_space<vmem>>, vector<8x128xf32>
    %c0_3 = arith.constant 0 : index
    %c0_4 = arith.constant 0 : index
    %2 = vector.load %arg1[%c0_3, %c0_4] : memref<128x1xi32, #tpu.memory_space<vmem>>, vector<128x1xi32>
    %c0_5 = arith.constant 0 : index
    %c0_6 = arith.constant 0 : index
    %3 = vector.load %arg2[%c0_5, %c0_6] : memref<128x1xi32, #tpu.memory_space<vmem>>, vector<128x1xi32>
    %c0_7 = arith.constant 0 : index
    %c0_8 = arith.constant 0 : index
    %4 = vector.load %arg3[%c0_7, %c0_8] : memref<128x1xi32, #tpu.memory_space<vmem>>, vector<128x1xi32>
    %5 = tpu.iota {dimensions = array<i32: 1>} : vector<128x16xi32>
    %6 = tpu.iota {dimensions = array<i32: 1>} : vector<128x8xi32>
    %7 = vector.broadcast %2 : vector<128x1xi32> to vector<128x16xi32>
    %8 = arith.cmpi eq, %5, %7 : vector<128x16xi32>
    %9 = arith.extui %8 : vector<128x16xi1> to vector<128x16xi32>
    %10 = arith.sitofp %9 : vector<128x16xi32> to vector<128x16xf32>
    %11 = vector.broadcast %3 : vector<128x1xi32> to vector<128x16xi32>
    %12 = arith.cmpi eq, %5, %11 : vector<128x16xi32>
    %13 = arith.extui %12 : vector<128x16xi1> to vector<128x16xi32>
    %14 = arith.sitofp %13 : vector<128x16xi32> to vector<128x16xf32>
    %15 = vector.broadcast %4 : vector<128x1xi32> to vector<128x8xi32>
    %16 = arith.cmpi eq, %6, %15 : vector<128x8xi32>
    %17 = arith.extui %16 : vector<128x8xi1> to vector<128x8xi32>
    %18 = arith.sitofp %17 : vector<128x8xi32> to vector<128x8xf32>
    %cst = arith.constant dense<0.000000e+00> : vector<128x128xf32>
    %19 = tpu.matmul %10, %0, %cst {dimension_numbers = #tpu.dot_dimension_numbers<[1], [0], [0], [1], [0, 0, 1, 1], [], []>} : vector<128x16xf32>, vector<16x128xf32>, vector<128x128xf32> -> vector<128x128xf32>
    %cst_9 = arith.constant dense<0.000000e+00> : vector<128x128xf32>
    %20 = tpu.matmul %14, %0, %cst_9 {dimension_numbers = #tpu.dot_dimension_numbers<[1], [0], [0], [1], [0, 0, 1, 1], [], []>} : vector<128x16xf32>, vector<16x128xf32>, vector<128x128xf32> -> vector<128x128xf32>
    %cst_10 = arith.constant dense<0.000000e+00> : vector<128x128xf32>
    %21 = tpu.matmul %18, %1, %cst_10 {dimension_numbers = #tpu.dot_dimension_numbers<[1], [0], [0], [1], [0, 0, 1, 1], [], []>} : vector<128x8xf32>, vector<8x128xf32>, vector<128x128xf32> -> vector<128x128xf32>
    %22 = arith.mulf %19, %21 : vector<128x128xf32>
    %23 = arith.mulf %22, %20 : vector<128x128xf32>
    %cst_11 = arith.constant dense<0.000000e+00> : vector<128xf32>
    %24 = vector.multi_reduction <add>, %23, %cst_11 [1] : vector<128x128xf32> to vector<128xf32>
    %25 = arith.negf %24 : vector<128xf32>
    %26 = math.exp %25 : vector<128xf32>
    %cst_12 = arith.constant 1.000000e+00 : f32
    %27 = vector.broadcast %cst_12 : f32 to vector<128xf32>
    %28 = arith.addf %27, %26 : vector<128xf32>
    %29 = arith.divf %27, %28 : vector<128xf32>
    %30 = vector.shape_cast %29 : vector<128xf32> to vector<1x128xf32>
    %c0_13 = arith.constant 0 : index
    %c0_14 = arith.constant 0 : index
    %31 = vector.load %arg6[%c0_13, %c0_14] : memref<1x128xf32, #tpu.memory_space<vmem>>, vector<1x128xf32>
    tpu.vector_store %arg6[%c0_13, %c0_14], %30 {strides = array<i32>} : memref<1x128xf32, #tpu.memory_space<vmem>>, vector<1x128xf32>,
    return
  }
  func.func @transform_0(%arg0: i32) -> (i32, i32) {
    %c0_i32 = arith.constant 0 : i32
    %c0_i32_0 = arith.constant 0 : i32
    return %arg0, %c0_i32 : i32, i32
  }
  func.func @transform_1(%arg0: i32) -> (i32, i32) {
    %c0_i32 = arith.constant 0 : i32
    %c0_i32_0 = arith.constant 0 : i32
    return %arg0, %c0_i32 : i32, i32
  }
  func.func @transform_2(%arg0: i32) -> (i32, i32) {
    %c0_i32 = arith.constant 0 : i32
    %c0_i32_0 = arith.constant 0 : i32
    return %arg0, %c0_i32 : i32, i32
  }
  func.func @transform_3(%arg0: i32) -> (i32, i32) {
    %c0_i32 = arith.constant 0 : i32
    %c0_i32_0 = arith.constant 0 : i32
    %c0_i32_1 = arith.constant 0 : i32
    return %c0_i32, %c0_i32_0 : i32, i32
  }
  func.func @transform_4(%arg0: i32) -> (i32, i32) {
    %c0_i32 = arith.constant 0 : i32
    %c0_i32_0 = arith.constant 0 : i32
    %c0_i32_1 = arith.constant 0 : i32
    return %c0_i32, %c0_i32_0 : i32, i32
  }
  func.func @transform_5(%arg0: i32) -> (i32, i32) {
    %c0_i32 = arith.constant 0 : i32
    %c0_i32_0 = arith.constant 0 : i32
    return %c0_i32, %arg0 : i32, i32
  }
}

</mosaic_0001>

<bundles_post_ra>
// kernel: tpu_custom_call.1
= control target key start
LH: loop header
LB: loop body
LE: loop exit
PB: predicated region body
PF: predicated region fallthrough
CT: control target
= control target key end

     0   :  { %v1594_v2 = vmov 0   ;;  %s2002_s0 = inlined_call_operand.vmem [shape: s32[128,1], index: 0, kind: input, shape index: {}]   ;;  %s2003_s1 = inlined_call_operand.vmem [shape: s32[128,1], index: 1, kind: input, shape index: {}]   ;;  %s2004_s2 = inlined_call_operand.vmem [shape: s32[128,1], index: 2, kind: input, shape index: {}]   ;;  %s2005_s3 = inlined_call_operand.vmem [shape: f32[16,128], index: 3, kind: input, shape index: {}]   ;;  %s2006_s4 = inlined_call_operand.vmem [shape: f32[8,128], index: 4, kind: input, shape index: {}]   ;;  %s2007_s5 = inlined_call_operand.hbm [shape: f32[1,128], index: 5, kind: output, shape index: {}]  }
   0x1   :  { %v32_v0 = vld [vmem:[%s2002_s0 + $0x40] sm:$0xff]  ;;  %1505 = vset.pattern.permute.xlu1 %v1594_v2  ;;  %1504 = vset.pattern.permute.xlu0 %v1594_v2  ;;  %v33_v3 = vld [vmem:[%s2002_s0 + $0x48] sm:$0xff]  ;;  %v27_v5 = vld [vmem:[%s2002_s0 + $0x18] sm:$0xff] }
   0x2   :  { %v24_v1 = vld [vmem:[%s2002_s0] sm:$0xff]  ;;  %99 = vperm.xlu1 %1505, %v32_v0   ;;  %v25_v4 = vld [vmem:[%s2002_s0 + $0x8] sm:$0xff]  ;;  %v26_v6 = vld [vmem:[%s2002_s0 + $0x10] sm:$0xff] }
   0x3   :  { %75 = vperm.xlu0 %1504, %v24_v1   ;;  %v35_v7 = vld [vmem:[%s2002_s0 + $0x58] sm:$0xff]  ;;  %v34_v8 = vld [vmem:[%s2002_s0 + $0x50] sm:$0xff]  ;;  %v29_v9 = vld [vmem:[%s2002_s0 + $0x28] sm:$0xff] }
   0x4   :  { %v28_v10 = vld [vmem:[%s2002_s0 + $0x20] sm:$0xff]  ;;  %v22_v12 = vld [vmem:[%s2005_s3 + $0x8] sm:$0xff] }
   0x5   :  { %v21_v11 = vld [vmem:[%s2005_s3] sm:$0xff] }
   0x6   :  { %102 = vperm.xlu1 %1505, %v33_v3  }
   0x7   :  { %78 = vperm.xlu0 %1504, %v25_v4  }
   0xa   :  { %84 = vperm.xlu1 %1505, %v27_v5  }
   0xb   :  { %81 = vperm.xlu0 %1504, %v26_v6  }
   0xe   :  { %108 = vperm.xlu1 %1505, %v35_v7  }
   0xf   :  { %105 = vperm.xlu0 %1504, %v34_v8  }
  0x10   :  { %10 = vsyncpa [#allocation3], 0  ;;  %v1663_v13 = vpack.c.bf16 %v22_v12, %v21_v11  ;;  %v37_v14 = vld [vmem:[%s2002_s0 + $0x68] sm:$0xff]  ;;  %v36_v15 = vld [vmem:[%s2002_s0 + $0x60] sm:$0xff]  ;;  %v72_v53 = vlaneseq  ;;  %vm362_vm0 = vcmask 130048   ;;  %v1595_v57 = vmov 0.0  }
  0x11   :  { %v31_v16 = vld [vmem:[%s2002_s0 + $0x38] sm:$0xff]  ;;  %v30_v17 = vld [vmem:[%s2002_s0 + $0x30] sm:$0xff]  ;;  %v57_v20 = vld [vmem:[%s2004_s2 + $0x8] sm:$0xff] }
  0x12   :  { %90 = vperm.xlu1 %1505, %v29_v9   ;;  %1492 = vmatprep.subr.bf16.mxu0 %v1663_v13  ;;  %v39_v18 = vld [vmem:[%s2002_s0 + $0x78] sm:$0xff]  ;;  %v38_v19 = vld [vmem:[%s2002_s0 + $0x70] sm:$0xff]  ;;  %v56_v21 = vld [vmem:[%s2004_s2] sm:$0xff]  ;;  %v1791_v54 = vand.u32 127, %v72_v53 }
  0x13   :  { %87 = vperm.xlu0 %1504, %v28_v10   ;;  %1499 = vmatprep.subr.bf16.mxu1 %v1663_v13  ;;  %v1697_v22 = vld [vmem:[%s2006_s4] sm:$0xff]  ;;  %v41_v23 = vld [vmem:[%s2003_s1 + $0x8] sm:$0xff]  ;;  %v59_v25 = vld [vmem:[%s2004_s2 + $0x18] sm:$0xff] }
  0x14   :  { %1494 = vmatpush3.bf16.msra.mxu0 %v1663_v13  ;;  %1500 = vmatpush3.bf16.msra.mxu1 %v1663_v13  ;;  %v40_v24 = vld [vmem:[%s2003_s1] sm:$0xff]  ;;  %v58_v26 = vld [vmem:[%s2004_s2 + $0x10] sm:$0xff]  ;;  %v43_v27 = vld [vmem:[%s2003_s1 + $0x18] sm:$0xff] }
  0x15   :  { %1496 = vmatprep.subr.bf16.mxu1 %v1663_v13  ;;  %1465 = vmatprep.subr.mxu0 %v1697_v22  ;;  %v42_v28 = vld [vmem:[%s2003_s1 + $0x10] sm:$0xff]  ;;  %v61_v29 = vld [vmem:[%s2004_s2 + $0x28] sm:$0xff]  ;;  %v60_v30 = vld [vmem:[%s2004_s2 + $0x20] sm:$0xff] }
  0x16   :  { %114 = vperm.xlu1 %1505, %v37_v14   ;;  %v45_v31 = vld [vmem:[%s2003_s1 + $0x28] sm:$0xff]  ;;  %v44_v32 = vld [vmem:[%s2003_s1 + $0x20] sm:$0xff]  ;;  %v63_v33 = vld [vmem:[%s2004_s2 + $0x38] sm:$0xff] }
  0x17   :  { %111 = vperm.xlu0 %1504, %v36_v15   ;;  %v62_v34 = vld [vmem:[%s2004_s2 + $0x30] sm:$0xff]  ;;  %v47_v35 = vld [vmem:[%s2003_s1 + $0x38] sm:$0xff]  ;;  %v65_v37 = vld [vmem:[%s2004_s2 + $0x48] sm:$0xff] }
  0x18   :  { %v46_v36 = vld [vmem:[%s2003_s1 + $0x30] sm:$0xff]  ;;  %v64_v38 = vld [vmem:[%s2004_s2 + $0x40] sm:$0xff]  ;;  %v49_v39 = vld [vmem:[%s2003_s1 + $0x48] sm:$0xff] }
  0x19   :  { %v48_v40 = vld [vmem:[%s2003_s1 + $0x40] sm:$0xff]  ;;  %v67_v41 = vld [vmem:[%s2004_s2 + $0x58] sm:$0xff]  ;;  %v66_v42 = vld [vmem:[%s2004_s2 + $0x50] sm:$0xff] }
  0x1a   :  { %96 = vperm.xlu1 %1505, %v31_v16   ;;  %v51_v43 = vld [vmem:[%s2003_s1 + $0x58] sm:$0xff]  ;;  %v50_v44 = vld [vmem:[%s2003_s1 + $0x50] sm:$0xff]  ;;  %v69_v45 = vld [vmem:[%s2004_s2 + $0x68] sm:$0xff] }
  0x1b   :  { %93 = vperm.xlu0 %1504, %v30_v17   ;;  %v68_v46 = vld [vmem:[%s2004_s2 + $0x60] sm:$0xff]  ;;  %v53_v47 = vld [vmem:[%s2003_s1 + $0x68] sm:$0xff]  ;;  %v71_v49 = vld [vmem:[%s2004_s2 + $0x78] sm:$0xff] }
  0x1c   :  { %v52_v48 = vld [vmem:[%s2003_s1 + $0x60] sm:$0xff]  ;;  %v70_v50 = vld [vmem:[%s2004_s2 + $0x70] sm:$0xff]  ;;  %v55_v51 = vld [vmem:[%s2003_s1 + $0x78] sm:$0xff] }
  0x1d   :  { %v54_v52 = vld [vmem:[%s2003_s1 + $0x70] sm:$0xff]  ;;  %s1596_s1 = smov [#allocation2]  }
  0x1e   :  { %120 = vperm.xlu1 %1505, %v39_v18   ;;  %s1236_s2 = sshll.u32 %s1596_s1, 4  ;;  %s1237_s2 = int_to_ptr.vmem [resolvable:$true] %s1236_s2 }
  0x1f   :  { %117 = vperm.xlu0 %1504, %v38_v19   ;;  %s1570_s12 = scalar_lea.vmem %s1237_s2, 16  ;;  %s1574_s13 = scalar_lea.vmem %s1237_s2, 32 }
  0x20   :  { %p1571_p0 = scmp.ne.s32.totalorder %s1237_s2, %s1570_s12  ;;  %p1575_p1 = scmp.lt.s32.totalorder %s1237_s2, %s1237_s2 }
  0x21   :  { %p1576_p2 = scmp.lt.s32.totalorder %s1574_s13, %s1570_s12 }
  0x22   :  { %270 = vperm.xlu1 %1505, %v57_v20  }
  0x23   :  { %267 = vperm.xlu0 %1504, %v56_v21   ;;  %p1577_p3 = por %p1576_p2, %p1575_p1 }
  0x25   :  { %p1578_p4 = pnand %p1577_p3, %p1571_p0 }
  0x26   :  { %174 = vperm.xlu1 %1505, %v41_v23  }
  0x27   :  { %171 = vperm.xlu0 %1504, %v40_v24  }
  0x2a   :  { %276 = vperm.xlu1 %1505, %v59_v25  }
  0x2b   :  { %273 = vperm.xlu0 %1504, %v58_v26  }
  0x2e   :  { %180 = vperm.xlu1 %1505, %v43_v27  }
  0x2f   :  { %177 = vperm.xlu0 %1504, %v42_v28  }
  0x32   :  { %282 = vperm.xlu1 %1505, %v61_v29  }
  0x33   :  { %279 = vperm.xlu0 %1504, %v60_v30  }
  0x36   :  { %186 = vperm.xlu1 %1505, %v45_v31  }
  0x37   :  { %183 = vperm.xlu0 %1504, %v44_v32  }
  0x3a   :  { %288 = vperm.xlu1 %1505, %v63_v33  }
  0x3b   :  { %285 = vperm.xlu0 %1504, %v62_v34  }
  0x3e   :  { %192 = vperm.xlu1 %1505, %v47_v35  }
  0x3f   :  { %189 = vperm.xlu0 %1504, %v46_v36  }
  0x42   :  { %294 = vperm.xlu1 %1505, %v65_v37  }
  0x43   :  { %291 = vperm.xlu0 %1504, %v64_v38  }
  0x46   :  { %198 = vperm.xlu1 %1505, %v49_v39  }
  0x47   :  { %195 = vperm.xlu0 %1504, %v48_v40  }
  0x4a   :  { %300 = vperm.xlu1 %1505, %v67_v41  }
  0x4b   :  { %297 = vperm.xlu0 %1504, %v66_v42  }
  0x4e   :  { %204 = vperm.xlu1 %1505, %v51_v43  }
  0x4f   :  { %201 = vperm.xlu0 %1504, %v50_v44  }
  0x52   :  { %306 = vperm.xlu1 %1505, %v69_v45  }
  0x53   :  { %303 = vperm.xlu0 %1504, %v68_v46  }
  0x56   :  { %210 = vperm.xlu1 %1505, %v53_v47  }
  0x57   :  { %207 = vperm.xlu0 %1504, %v52_v48  }
  0x5a   :  { %312 = vperm.xlu1 %1505, %v71_v49  }
  0x5b   :  { %309 = vperm.xlu0 %1504, %v70_v50  }
  0x5e   :  { %216 = vperm.xlu1 %1505, %v55_v51  }
  0x5f   :  { %213 = vperm.xlu0 %1504, %v54_v52  }
  0x81   :  { %v100_v55 = vpop.permute.xlu1 %99 }
  0x82   :  { %v76_v56 = vpop.permute.xlu0 %75  ;;  %vm130_vm1 = vcmp.eq.s32.totalorder %v1791_v54, %v100_v55 }
  0x83   :  { %vm122_vm2 = vcmp.eq.s32.totalorder %v1791_v54, %v76_v56  ;;  %v1252_v59 = vsel %vm130_vm1, 1.0, %v1595_v57 }
  0x84   :  { %v1244_v58 = vsel %vm122_vm2, 1.0, %v1595_v57  ;;  %1425 = vmatprep.mubr.msk.f32.mxu1 %vm362_vm0, %v1252_v59  ;;  %vm749_vm2 = vcmask 64512  }
  0x85   :  { %1413 = vmatprep.mubr.msk.f32.mxu0 %vm362_vm0, %v1244_v58  ;;  %v103_v60 = vpop.permute.xlu1 %102 }
  0x86   :  { %v79_v61 = vpop.permute.xlu0 %78  ;;  %vm131_vm3 = vcmp.eq.s32.totalorder %v1791_v54, %v103_v60 }
  0x87   :  { %vm123_vm4 = vcmp.eq.s32.totalorder %v1791_v54, %v79_v61  ;;  %v1253_v62 = vsel %vm131_vm3, 1.0, %v1595_v57 }
  0x88   :  { %v1245_v63 = vsel %vm123_vm4, 1.0, %v1595_v57  ;;  %1426 = vmatmul.mubr.msk.f32.vlgmr.msra.gmra.mrb[0].mxu1 %vm362_vm0, %v1253_v62 }
  0x89   :  { %1414 = vmatmul.mubr.msk.f32.vlgmr.msra.gmra.mrb[0].mxu0 %vm362_vm0, %v1245_v63  ;;  %v85_v0 = vpop.permute.xlu1 %84  ;;  %1498 = vmatpush3.bf16.msra.mxu1 %v1663_v13 }
  0x8a   :  { %v82_v1 = vpop.permute.xlu0 %81  ;;  %1466 = vmatpush3.msra.mxu0 %v1697_v22  ;;  %vm125_vm5 = vcmp.eq.s32.totalorder %v1791_v54, %v85_v0 }
  0x8b   :  { %vm124_vm6 = vcmp.eq.s32.totalorder %v1791_v54, %v82_v1  ;;  %v1247_v2 = vsel %vm125_vm5, 1.0, %v1595_v57 }
  0x8c   :  { %v1246_v3 = vsel %vm124_vm6, 1.0, %v1595_v57 }
  0x8d   :  { %1416 = vmatprep.mubr.msk.f32.mxu0 %vm362_vm0, %v1246_v3  ;;  %v109_v4 = vpop.permute.xlu1 %108 }
  0x8e   :  { %v106_v5 = vpop.permute.xlu0 %105  ;;  %1417 = vmatmul.mubr.msk.f32.gmra.mrb[2].mxu0 %vm362_vm0, %v1247_v2  ;;  %vm133_vm7 = vcmp.eq.s32.totalorder %v1791_v54, %v109_v4 }
  0x8f   :  { %vm132_vm8 = vcmp.eq.s32.totalorder %v1791_v54, %v106_v5  ;;  %v1255_v6 = vsel %vm133_vm7, 1.0, %v1595_v57 }
  0x90   :  { %v1254_v7 = vsel %vm132_vm8, 1.0, %v1595_v57 }
  0x91   :  { %1428 = vmatprep.mubr.msk.f32.mxu1 %vm362_vm0, %v1254_v7  ;;  %v91_v8 = vpop.permute.xlu1 %90 }
  0x92   :  { %v88_v9 = vpop.permute.xlu0 %87  ;;  %1429 = vmatmul.mubr.msk.f32.gmra.mrb[2].mxu1 %vm362_vm0, %v1255_v6  ;;  %vm127_vm9 = vcmp.eq.s32.totalorder %v1791_v54, %v91_v8 }
  0x93   :  { %vm126_vm10 = vcmp.eq.s32.totalorder %v1791_v54, %v88_v9  ;;  %v1249_v10 = vsel %vm127_vm9, 1.0, %v1595_v57 }
  0x94   :  { %v1248_v11 = vsel %vm126_vm10, 1.0, %v1595_v57 }
  0x95   :  { %1419 = vmatprep.mubr.msk.f32.mxu0 %vm362_vm0, %v1248_v11  ;;  %v115_v12 = vpop.permute.xlu1 %114 }
  0x96   :  { %v112_v13 = vpop.permute.xlu0 %111  ;;  %1420 = vmatmul.mubr.msk.f32.gmra.mrb[4].mxu0 %vm362_vm0, %v1249_v10  ;;  %vm135_vm11 = vcmp.eq.s32.totalorder %v1791_v54, %v115_v12 }
  0x97   :  { %vm134_vm12 = vcmp.eq.s32.totalorder %v1791_v54, %v112_v13  ;;  %v1257_v14 = vsel %vm135_vm11, 1.0, %v1595_v57 }
  0x98   :  { %v1256_v15 = vsel %vm134_vm12, 1.0, %v1595_v57 }
  0x99   :  { %1431 = vmatprep.mubr.msk.f32.mxu1 %vm362_vm0, %v1256_v15  ;;  %v97_v16 = vpop.permute.xlu1 %96 }
  0x9a   :  { %v94_v17 = vpop.permute.xlu0 %93  ;;  %1432 = vmatmul.mubr.msk.f32.gmra.mrb[4].mxu1 %vm362_vm0, %v1257_v14  ;;  %vm129_vm13 = vcmp.eq.s32.totalorder %v1791_v54, %v97_v16 }
  0x9b   :  { %vm128_vm14 = vcmp.eq.s32.totalorder %v1791_v54, %v94_v17  ;;  %v1251_v18 = vsel %vm129_vm13, 1.0, %v1595_v57 }
  0x9c   :  { %v1250_v19 = vsel %vm128_vm14, 1.0, %v1595_v57 }
  0x9d   :  { %1422 = vmatprep.mubr.msk.f32.mxu0 %vm362_vm0, %v1250_v19  ;;  %v121_v20 = vpop.permute.xlu1 %120 }
  0x9e   :  { %v118_v21 = vpop.permute.xlu0 %117  ;;  %1423 = vmatmul.mubr.msk.f32.gmra.mrb[6].mxu0 %vm362_vm0, %v1251_v18  ;;  %vm137_vm15 = vcmp.eq.s32.totalorder %v1791_v54, %v121_v20 }
  0x9f   :  { %vm136_vm1 = vcmp.eq.s32.totalorder %v1791_v54, %v118_v21  ;;  %v1259_v22 = vsel %vm137_vm15, 1.0, %v1595_v57 }
  0xa0   :  { %v1258_v23 = vsel %vm136_vm1, 1.0, %v1595_v57 }
  0xa1   :  { %1434 = vmatprep.mubr.msk.f32.mxu1 %vm362_vm0, %v1258_v23  ;;  %v271_v24 = vpop.permute.xlu1 %270 }
  0xa2   :  { %v268_v25 = vpop.permute.xlu0 %267  ;;  %1435 = vmatmul.mubr.msk.f32.gmra.mrb[6].mxu1 %vm362_vm0, %v1259_v22  ;;  %vm315_vm3 = vcmp.eq.s32.totalorder %v1791_v54, %v271_v24 }
  0xa3   :  { %vm314_vm4 = vcmp.eq.s32.totalorder %v1791_v54, %v268_v25  ;;  %v1277_v26 = vsel %vm315_vm3, 1.0, %v1595_v57 }
  0xa4   :  { %v1276_v27 = vsel %vm314_vm4, 1.0, %v1595_v57 }
  0xa5   :  { %1467 = vmatprep.mubr.msk.f32.mxu0 %vm749_vm2, %v1276_v27  ;;  %v175_v28 = vpop.permute.xlu1 %174 }
  0xa6   :  { %v172_v29 = vpop.permute.xlu0 %171  ;;  %1468 = vmatmul.mubr.msk.f32.vlgmr.msra.gmra.mrb[8].mxu0 %vm749_vm2, %v1277_v26  ;;  %vm219_vm5 = vcmp.eq.s32.totalorder %v1791_v54, %v175_v28 }
  0xa7   :  { %vm218_vm6 = vcmp.eq.s32.totalorder %v1791_v54, %v172_v29  ;;  %v1261_v30 = vsel %vm219_vm5, 1.0, %v1595_v57 }
  0xa8   :  { %v1260_v31 = vsel %vm218_vm6, 1.0, %v1595_v57 }
  0xa9   :  { %1441 = vmatprep.mubr.msk.f32.mxu1 %vm362_vm0, %v1260_v31  ;;  %v277_v32 = vpop.permute.xlu1 %276 }
  0xaa   :  { %v274_v33 = vpop.permute.xlu0 %273  ;;  %1442 = vmatmul.mubr.msk.f32.vlgmr.msra.gmra.mrb[8].mxu1 %vm362_vm0, %v1261_v30  ;;  %vm317_vm7 = vcmp.eq.s32.totalorder %v1791_v54, %v277_v32 }
  0xab   :  { %vm316_vm8 = vcmp.eq.s32.totalorder %v1791_v54, %v274_v33  ;;  %v1279_v34 = vsel %vm317_vm7, 1.0, %v1595_v57 }
  0xac   :  { %v1278_v35 = vsel %vm316_vm8, 1.0, %v1595_v57 }
  0xad   :  { %1470 = vmatprep.mubr.msk.f32.mxu0 %vm749_vm2, %v1278_v35  ;;  %v181_v36 = vpop.permute.xlu1 %180 }
  0xae   :  { %v178_v37 = vpop.permute.xlu0 %177  ;;  %1471 = vmatmul.mubr.msk.f32.gmra.mrb[10].mxu0 %vm749_vm2, %v1279_v34  ;;  %vm221_vm9 = vcmp.eq.s32.totalorder %v1791_v54, %v181_v36 }
  0xaf   :  { %vm220_vm10 = vcmp.eq.s32.totalorder %v1791_v54, %v178_v37  ;;  %v1263_v38 = vsel %vm221_vm9, 1.0, %v1595_v57 }
  0xb0   :  { %v1262_v39 = vsel %vm220_vm10, 1.0, %v1595_v57 }
  0xb1   :  { %1444 = vmatprep.mubr.msk.f32.mxu1 %vm362_vm0, %v1262_v39  ;;  %v283_v40 = vpop.permute.xlu1 %282 }
  0xb2   :  { %v280_v41 = vpop.permute.xlu0 %279  ;;  %1445 = vmatmul.mubr.msk.f32.gmra.mrb[10].mxu1 %vm362_vm0, %v1263_v38  ;;  %vm319_vm11 = vcmp.eq.s32.totalorder %v1791_v54, %v283_v40 }
  0xb3   :  { %vm318_vm12 = vcmp.eq.s32.totalorder %v1791_v54, %v280_v41  ;;  %v1281_v42 = vsel %vm319_vm11, 1.0, %v1595_v57 }
  0xb4   :  { %v1280_v43 = vsel %vm318_vm12, 1.0, %v1595_v57 }
  0xb5   :  { %1473 = vmatprep.mubr.msk.f32.mxu0 %vm749_vm2, %v1280_v43  ;;  %v187_v44 = vpop.permute.xlu1 %186 }
  0xb6   :  { %v184_v45 = vpop.permute.xlu0 %183  ;;  %1474 = vmatmul.mubr.msk.f32.gmra.mrb[12].mxu0 %vm749_vm2, %v1281_v42  ;;  %vm223_vm13 = vcmp.eq.s32.totalorder %v1791_v54, %v187_v44 }
  0xb7   :  { %vm222_vm14 = vcmp.eq.s32.totalorder %v1791_v54, %v184_v45  ;;  %v1265_v46 = vsel %vm223_vm13, 1.0, %v1595_v57 }
  0xb8   :  { %v1264_v47 = vsel %vm222_vm14, 1.0, %v1595_v57 }
  0xb9   :  { %1447 = vmatprep.mubr.msk.f32.mxu1 %vm362_vm0, %v1264_v47  ;;  %v289_v48 = vpop.permute.xlu1 %288 }
  0xba   :  { %v286_v49 = vpop.permute.xlu0 %285  ;;  %1448 = vmatmul.mubr.msk.f32.gmra.mrb[12].mxu1 %vm362_vm0, %v1265_v46  ;;  %vm321_vm15 = vcmp.eq.s32.totalorder %v1791_v54, %v289_v48 }
  0xbb   :  { %vm320_vm1 = vcmp.eq.s32.totalorder %v1791_v54, %v286_v49  ;;  %v1283_v50 = vsel %vm321_vm15, 1.0, %v1595_v57 }
  0xbc   :  { %v1282_v51 = vsel %vm320_vm1, 1.0, %v1595_v57 }
  0xbd   :  { %1476 = vmatprep.mubr.msk.f32.mxu0 %vm749_vm2, %v1282_v51  ;;  %v193_v52 = vpop.permute.xlu1 %192 }
  0xbe   :  { %v190_v55 = vpop.permute.xlu0 %189  ;;  %1477 = vmatmul.mubr.msk.f32.gmra.mrb[14].mxu0 %vm749_vm2, %v1283_v50  ;;  %vm225_vm3 = vcmp.eq.s32.totalorder %v1791_v54, %v193_v52 }
  0xbf   :  { %vm224_vm4 = vcmp.eq.s32.totalorder %v1791_v54, %v190_v55  ;;  %v1267_v56 = vsel %vm225_vm3, 1.0, %v1595_v57 }
  0xc0   :  { %v1266_v58 = vsel %vm224_vm4, 1.0, %v1595_v57 }
  0xc1   :  { %1450 = vmatprep.mubr.msk.f32.mxu1 %vm362_vm0, %v1266_v58  ;;  %v295_v59 = vpop.permute.xlu1 %294 }
  0xc2   :  { %v292_v60 = vpop.permute.xlu0 %291  ;;  %1451 = vmatmul.mubr.msk.f32.gmra.mrb[14].mxu1 %vm362_vm0, %v1267_v56  ;;  %vm323_vm5 = vcmp.eq.s32.totalorder %v1791_v54, %v295_v59 }
  0xc3   :  { %vm322_vm6 = vcmp.eq.s32.totalorder %v1791_v54, %v292_v60  ;;  %v1285_v61 = vsel %vm323_vm5, 1.0, %v1595_v57 }
  0xc4   :  { %v1284_v62 = vsel %vm322_vm6, 1.0, %v1595_v57 }
  0xc5   :  { %1479 = vmatprep.mubr.msk.f32.mxu0 %vm749_vm2, %v1284_v62  ;;  %v199_v63 = vpop.permute.xlu1 %198 }
  0xc6   :  { %v196_v0 = vpop.permute.xlu0 %195  ;;  %1480 = vmatmul.mubr.msk.f32.gmra.mrb[16].mxu0 %vm749_vm2, %v1285_v61  ;;  %vm227_vm7 = vcmp.eq.s32.totalorder %v1791_v54, %v199_v63 }
  0xc7   :  { %vm226_vm8 = vcmp.eq.s32.totalorder %v1791_v54, %v196_v0  ;;  %v1269_v1 = vsel %vm227_vm7, 1.0, %v1595_v57  ;;  %vm1142_vm7 = vcmask 261312  }
  0xc8   :  { %v1268_v2 = vsel %vm226_vm8, 1.0, %v1595_v57  ;;  %vm1149_vm8 = vcmask 326912  }
  0xc9   :  { %1453 = vmatprep.mubr.msk.f32.mxu1 %vm362_vm0, %v1268_v2  ;;  %v301_v3 = vpop.permute.xlu1 %300 }
  0xca   :  { %v298_v4 = vpop.permute.xlu0 %297  ;;  %1454 = vmatmul.mubr.msk.f32.gmra.mrb[16].mxu1 %vm362_vm0, %v1269_v1  ;;  %vm325_vm9 = vcmp.eq.s32.totalorder %v1791_v54, %v301_v3 }
  0xcb   :  { %vm324_vm10 = vcmp.eq.s32.totalorder %v1791_v54, %v298_v4  ;;  %v1287_v5 = vsel %vm325_vm9, 1.0, %v1595_v57  ;;  %vm1156_vm9 = vcmask 392512  }
  0xcc   :  { %v1286_v6 = vsel %vm324_vm10, 1.0, %v1595_v57  ;;  %vm1163_vm10 = vcmask 458112  }
  0xcd   :  { %1482 = vmatprep.mubr.msk.f32.mxu0 %vm749_vm2, %v1286_v6  ;;  %v205_v7 = vpop.permute.xlu1 %204 }
  0xce   :  { %v202_v8 = vpop.permute.xlu0 %201  ;;  %1483 = vmatmul.mubr.msk.f32.gmra.mrb[18].mxu0 %vm749_vm2, %v1287_v5  ;;  %vm229_vm11 = vcmp.eq.s32.totalorder %v1791_v54, %v205_v7 }
  0xcf   :  { %vm228_vm12 = vcmp.eq.s32.totalorder %v1791_v54, %v202_v8  ;;  %v1271_v9 = vsel %vm229_vm11, 1.0, %v1595_v57  ;;  %vm1170_vm11 = vcmask 523712  }
  0xd0   :  { %v1270_v10 = vsel %vm228_vm12, 1.0, %v1595_v57  ;;  %vm1177_vm12 = vcmask 589312  }
  0xd1   :  { %1456 = vmatprep.mubr.msk.f32.mxu1 %vm362_vm0, %v1270_v10  ;;  %v307_v11 = vpop.permute.xlu1 %306 }
  0xd2   :  { %v304_v12 = vpop.permute.xlu0 %303  ;;  %1457 = vmatmul.mubr.msk.f32.gmra.mrb[18].mxu1 %vm362_vm0, %v1271_v9  ;;  %vm327_vm13 = vcmp.eq.s32.totalorder %v1791_v54, %v307_v11 }
  0xd3   :  { %vm326_vm14 = vcmp.eq.s32.totalorder %v1791_v54, %v304_v12  ;;  %v1289_v13 = vsel %vm327_vm13, 1.0, %v1595_v57  ;;  %vm1184_vm13 = vcmask 654912  }
  0xd4   :  { %v1288_v14 = vsel %vm326_vm14, 1.0, %v1595_v57  ;;  %vm1191_vm14 = vcmask 720512  }
  0xd5   :  { %1485 = vmatprep.mubr.msk.f32.mxu0 %vm749_vm2, %v1288_v14  ;;  %v211_v15 = vpop.permute.xlu1 %210 }
  0xd6   :  { %v208_v16 = vpop.permute.xlu0 %207  ;;  %1486 = vmatmul.mubr.msk.f32.gmra.mrb[20].mxu0 %vm749_vm2, %v1289_v13  ;;  %vm231_vm15 = vcmp.eq.s32.totalorder %v1791_v54, %v211_v15 }
  0xd7   :  { %vm230_vm1 = vcmp.eq.s32.totalorder %v1791_v54, %v208_v16  ;;  %v1273_v17 = vsel %vm231_vm15, 1.0, %v1595_v57  ;;  %vm1198_vm15 = vcmask 786112  }
  0xd8   :  { %v1272_v18 = vsel %vm230_vm1, 1.0, %v1595_v57  ;;  %vm1205_vm1 = vcmask 851712  }
  0xd9   :  { %1459 = vmatprep.mubr.msk.f32.mxu1 %vm362_vm0, %v1272_v18  ;;  %v313_v19 = vpop.permute.xlu1 %312 }
  0xda   :  { %v310_v20 = vpop.permute.xlu0 %309  ;;  %1460 = vmatmul.mubr.msk.f32.gmra.mrb[20].mxu1 %vm362_vm0, %v1273_v17  ;;  %vm329_vm3 = vcmp.eq.s32.totalorder %v1791_v54, %v313_v19 }
  0xdb   :  { %vm328_vm4 = vcmp.eq.s32.totalorder %v1791_v54, %v310_v20  ;;  %v1291_v21 = vsel %vm329_vm3, 1.0, %v1595_v57  ;;  %vm1212_vm3 = vcmask 917312  }
  0xdc   :  { %v1290_v22 = vsel %vm328_vm4, 1.0, %v1595_v57  ;;  %vm1219_vm4 = vcmask 982912  }
  0xdd   :  { %1488 = vmatprep.mubr.msk.f32.mxu0 %vm749_vm2, %v1290_v22  ;;  %v217_v23 = vpop.permute.xlu1 %216 }
  0xde   :  { %v214_v24 = vpop.permute.xlu0 %213  ;;  %1489 = vmatmul.mubr.msk.f32.gmra.mrb[22].mxu0 %vm749_vm2, %v1291_v21  ;;  %vm233_vm5 = vcmp.eq.s32.totalorder %v1791_v54, %v217_v23  ;;  %vm1135_vm2 = vcmask 195712  }
  0xdf   :  { %vm232_vm6 = vcmp.eq.s32.totalorder %v1791_v54, %v214_v24  ;;  %v1275_v25 = vsel %vm233_vm5, 1.0, %v1595_v57  ;;  %vm1226_vm5 = vcmask 1048512  }
  0xe0   :  { %v1274_v26 = vsel %vm232_vm6, 1.0, %v1595_v57 }
  0xe1   :  { %1462 = vmatprep.mubr.msk.f32.mxu1 %vm362_vm0, %v1274_v26 }
  0xe2   :  { %1463 = vmatmul.mubr.msk.f32.gmra.mrb[22].mxu1 %vm362_vm0, %v1275_v25  ;;  %vm1128_vm0 = vcmask 130112  }
 0x15b   :  { %v1427_v28 = vpop.f32.mrb[0].mxu1 }
 0x15c   :  { %v1415_v27 = vpop.f32.mrb[0].mxu0  ;;  %v517_v30 = vpop.f32.mrb[1].mxu1 }
 0x15d   :  { %v477_v29 = vpop.f32.mrb[1].mxu0 }
 0x161   :  { %v1418_v31 = vpop.f32.mrb[2].mxu0 }
 0x162   :  { %v487_v32 = vpop.f32.mrb[3].mxu0 }
 0x165   :  { %v1430_v33 = vpop.f32.mrb[2].mxu1 }
 0x166   :  { %v527_v34 = vpop.f32.mrb[3].mxu1 }
 0x169   :  { %v1421_v35 = vpop.f32.mrb[4].mxu0 }
 0x16a   :  { %v497_v36 = vpop.f32.mrb[5].mxu0 }
 0x16d   :  { %v1939_v37 = vpop.f32.mrb[4].mxu1 }
 0x16e   :  { %v1941_v38 = vpop.f32.mrb[5].mxu1 }
 0x171   :  { %v1424_v39 = vpop.f32.mrb[6].mxu0 }
 0x172   :  { %v507_v57 = vpop.f32.mrb[7].mxu0 }
 0x175   :  { %v1943_v40 = vpop.f32.mrb[6].mxu1 }
 0x176   :  { %v1945_v41 = vpop.f32.mrb[7].mxu1 }
 0x179   :  { %v1469_v42 = vpop.f32.mrb[8].mxu0 }
 0x17a   :  { %v944_v43 = vmul.f32 %v1469_v42, %v1415_v27  ;;  %v864_v44 = vpop.f32.mrb[9].mxu0 }
 0x17b   :  { %v943_v45 = vmul.f32 %v864_v44, %v477_v29 }
 0x17d   :  { %v1443_v46 = vpop.f32.mrb[8].mxu1 }
 0x17e   :  { %v960_v47 = vmul.f32 %v1443_v46, %v944_v43  ;;  %v670_v48 = vpop.f32.mrb[9].mxu1 }
 0x17f   :  { %v959_v49 = vmul.f32 %v943_v45, %v670_v48 }
 0x180   :  { %977 = vadd.xlane.f32.xlu1 %v960_v47 }
 0x181   :  { %975 = vadd.xlane.f32.xlu0 %v959_v49  ;;  %v1472_v50 = vpop.f32.mrb[10].mxu0 }
 0x182   :  { %v946_v51 = vmul.f32 %v1472_v50, %v1418_v31  ;;  %v874_v52 = vpop.f32.mrb[11].mxu0 }
 0x183   :  { %v945_v55 = vmul.f32 %v874_v52, %v487_v32 }
 0x185   :  { %v1446_v56 = vpop.f32.mrb[10].mxu1 }
 0x186   :  { %v962_v58 = vmul.f32 %v1446_v56, %v946_v51  ;;  %v680_v59 = vpop.f32.mrb[11].mxu1 }
 0x187   :  { %v961_v60 = vmul.f32 %v945_v55, %v680_v59 }
 0x188   :  { %981 = vadd.xlane.f32.xlu0 %v962_v58 }
 0x189   :  { %v1475_v61 = vpop.f32.mrb[12].mxu0 }
 0x18a   :  { %v948_v62 = vmul.f32 %v1475_v61, %v1421_v35  ;;  %v884_v63 = vpop.f32.mrb[13].mxu0 }
 0x18b   :  { %v947_v0 = vmul.f32 %v884_v63, %v497_v36 }
 0x18c   :  { %979 = vadd.xlane.f32.xlu0 %v961_v60 }
 0x18d   :  { %v1449_v1 = vpop.f32.mrb[12].mxu1 }
 0x18e   :  { %v964_v2 = vmul.f32 %v1449_v1, %v948_v62  ;;  %v690_v3 = vpop.f32.mrb[13].mxu1 }
 0x18f   :  { %v963_v4 = vmul.f32 %v947_v0, %v690_v3 }
 0x190   :  { %985 = vadd.xlane.f32.xlu0 %v964_v2 }
 0x191   :  { %983 = vadd.xlane.f32.xlu1 %v963_v4  ;;  %v1478_v5 = vpop.f32.mrb[14].mxu0 }
 0x192   :  { %v950_v6 = vmul.f32 %v1478_v5, %v1424_v39  ;;  %v894_v7 = vpop.f32.mrb[15].mxu0 }
 0x193   :  { %v949_v8 = vmul.f32 %v894_v7, %v507_v57 }
 0x195   :  { %v1452_v9 = vpop.f32.mrb[14].mxu1 }
 0x196   :  { %v966_v10 = vmul.f32 %v1452_v9, %v950_v6  ;;  %v700_v11 = vpop.f32.mrb[15].mxu1 }
 0x197   :  { %v965_v12 = vmul.f32 %v949_v8, %v700_v11 }
 0x198   :  { %989 = vadd.xlane.f32.xlu0 %v966_v10 }
 0x199   :  { %987 = vadd.xlane.f32.xlu1 %v965_v12  ;;  %v1481_v13 = vpop.f32.mrb[16].mxu0 }
 0x19a   :  { %v952_v14 = vmul.f32 %v1481_v13, %v1427_v28  ;;  %v904_v15 = vpop.f32.mrb[17].mxu0 }
 0x19b   :  { %v951_v16 = vmul.f32 %v904_v15, %v517_v30 }
 0x19d   :  { %v1455_v17 = vpop.f32.mrb[16].mxu1 }
 0x19e   :  { %v968_v18 = vmul.f32 %v1455_v17, %v952_v14  ;;  %v710_v19 = vpop.f32.mrb[17].mxu1 }
 0x19f   :  { %v967_v20 = vmul.f32 %v951_v16, %v710_v19 }
 0x1a0   :  { %993 = vadd.xlane.f32.xlu0 %v968_v18 }
 0x1a1   :  { %991 = vadd.xlane.f32.xlu1 %v967_v20  ;;  %v1484_v21 = vpop.f32.mrb[18].mxu0  ;;  %v1952_v20 = vshrl.u32 %v72_v53, 7 }
 0x1a2   :  { %v954_v22 = vmul.f32 %v1484_v21, %v1430_v33  ;;  %v914_v23 = vpop.f32.mrb[19].mxu0  ;;  %v1123_v21 = vadd.s32 4294967288, %v1791_v54 }
 0x1a3   :  { %v953_v24 = vmul.f32 %v914_v23, %v527_v34 }
 0x1a4   :  { %v1126_v53 = vsub.s32 %v1123_v21, %v1952_v20 }
 0x1a5   :  { %v1458_v25 = vpop.f32.mrb[18].mxu1 }
 0x1a6   :  { %v970_v26 = vmul.f32 %v1458_v25, %v954_v22  ;;  %v720_v27 = vpop.f32.mrb[19].mxu1 }
 0x1a7   :  { %v969_v29 = vmul.f32 %v953_v24, %v720_v27  ;;  %v1130_v27 = vadd.s32 4294967280, %v1791_v54 }
 0x1a8   :  { %997 = vadd.xlane.f32.xlu0 %v970_v26 }
 0x1a9   :  { %995 = vadd.xlane.f32.xlu1 %v969_v29  ;;  %v1487_v31 = vpop.f32.mrb[20].mxu0 }
 0x1aa   :  { %v956_v28 = vmul.f32 %v1487_v31, %v1939_v37  ;;  %v924_v30 = vpop.f32.mrb[21].mxu0 }
 0x1ab   :  { %v955_v32 = vmul.f32 %v924_v30, %v1941_v38 }
 0x1ad   :  { %v1461_v35 = vpop.f32.mrb[20].mxu1 }
 0x1ae   :  { %v972_v36 = vmul.f32 %v1461_v35, %v956_v28  ;;  %v730_v39 = vpop.f32.mrb[21].mxu1 }
 0x1af   :  { %v971_v57 = vmul.f32 %v955_v32, %v730_v39  ;;  %v1144_v32 = vadd.s32 4294967264, %v1791_v54 }
 0x1b0   :  { %1001 = vadd.xlane.f32.xlu0 %v972_v36  ;;  %v1121_v36 = vsub.s32 %v1791_v54, %v1952_v20 }
 0x1b1   :  { %999 = vadd.xlane.f32.xlu1 %v971_v57  ;;  %v1490_v33 = vpop.f32.mrb[22].mxu0 }
 0x1b2   :  { %v958_v34 = vmul.f32 %v1490_v33, %v1943_v40  ;;  %v934_v42 = vpop.f32.mrb[23].mxu0  ;;  %v1133_v33 = vsub.s32 %v1130_v27, %v1952_v20 }
 0x1b3   :  { %v957_v43 = vmul.f32 %v934_v42, %v1945_v41 }
 0x1b5   :  { %v1464_v44 = vpop.f32.mrb[22].mxu1 }
 0x1b6   :  { %v974_v45 = vmul.f32 %v1464_v44, %v958_v34  ;;  %v740_v46 = vpop.f32.mrb[23].mxu1 }
 0x1b7   :  { %v973_v47 = vmul.f32 %v957_v43, %v740_v46  ;;  %v1137_v43 = vadd.s32 4294967272, %v1791_v54  ;;  %v1147_v46 = vsub.s32 %v1144_v32, %v1952_v20 }
 0x1b8   :  { %1005 = vadd.xlane.f32.xlu0 %v974_v45  ;;  %v1151_v45 = vadd.s32 4294967256, %v1791_v54 }
 0x1b9   :  { %1003 = vadd.xlane.f32.xlu1 %v973_v47  ;;  %v1158_v47 = vadd.s32 4294967248, %v1791_v54 }
 0x20d   :  { %v978_v48 = vpop.xlane.xlu1 %977 }
 0x20e   :  { %v976_v37 = vpop.xlane.xlu0 %975  ;;  %v1341_v49 = vmul.f32 -1.442695, %v978_v48 }
 0x20f   :  { %v1340_v51 = vmul.f32 -1.442695, %v976_v37 }
 0x210   :  { %1506 = vpow2.f32 %v1341_v49 }
 0x211   :  { %1508 = vpow2.f32 %v1340_v51 }
 0x215   :  { %v982_v38 = vpop.xlane.xlu0 %981 }
 0x216   :  { %v1343_v41 = vmul.f32 -1.442695, %v982_v38 }
 0x219   :  { %v980_v50 = vpop.xlane.xlu0 %979 }
 0x21a   :  { %v1342_v52 = vmul.f32 -1.442695, %v980_v50  ;;  %v1507_v60 = vpop.eup %1506 }
 0x21b   :  { %v1509_v0 = vpop.eup %1508  ;;  %v1056_v1 = vadd.f32 1.0, %v1507_v60 }
 0x21c   :  { %1510 = vpow2.f32 %v1342_v52  ;;  %v1055_v5 = vadd.f32 1.0, %v1509_v0 }
 0x21d   :  { %v986_v58 = vpop.xlane.xlu0 %985 }
 0x21e   :  { %v984_v55 = vpop.xlane.xlu1 %983  ;;  %v1345_v61 = vmul.f32 -1.442695, %v986_v58 }
 0x21f   :  { %v1344_v40 = vmul.f32 -1.442695, %v984_v55 }
 0x221   :  { %1512 = vpow2.f32 %v1344_v40 }
 0x222   :  { %1514 = vpow2.f32 %v1343_v41  ;;  %v1140_v41 = vsub.s32 %v1137_v43, %v1952_v20 }
 0x225   :  { %v990_v63 = vpop.xlane.xlu0 %989 }
 0x226   :  { %v988_v56 = vpop.xlane.xlu1 %987  ;;  %v1511_v2 = vpop.eup %1510  ;;  %v1347_v4 = vmul.f32 -1.442695, %v990_v63  ;;  %v1172_v63 = vadd.s32 4294967232, %v1791_v54 }
 0x227   :  { %v1346_v59 = vmul.f32 -1.442695, %v988_v56  ;;  %v1057_v7 = vadd.f32 1.0, %v1511_v2 }
 0x229   :  { %1516 = vpow2.f32 %v1346_v59  ;;  %v1154_v59 = vsub.s32 %v1151_v45, %v1952_v20 }
 0x22a   :  { %1518 = vpow2.f32 %v1345_v61 }
 0x22b   :  { %1520 = vrcp.f32 %v1056_v1  ;;  %v1513_v8 = vpop.eup %1512 }
 0x22c   :  { %v1515_v13 = vpop.eup %1514  ;;  %v1059_v15 = vadd.f32 1.0, %v1513_v8 }
 0x22d   :  { %v994_v6 = vpop.xlane.xlu0 %993  ;;  %v1058_v17 = vadd.f32 1.0, %v1515_v13 }
 0x22e   :  { %v992_v62 = vpop.xlane.xlu1 %991  ;;  %v1349_v9 = vmul.f32 -1.442695, %v994_v6  ;;  %v1165_v6 = vadd.s32 4294967240, %v1791_v54 }
 0x22f   :  { %v1348_v3 = vmul.f32 -1.442695, %v992_v62  ;;  %v1161_v62 = vsub.s32 %v1158_v47, %v1952_v20 }
 0x231   :  { %1522 = vpow2.f32 %v1348_v3 }
 0x232   :  { %1524 = vpow2.f32 %v1347_v4 }
 0x233   :  { %1526 = vrcp.f32 %v1055_v5  ;;  %v1517_v14 = vpop.eup %1516 }
 0x234   :  { %1528 = vrcp.f32 %v1057_v7  ;;  %v1519_v18 = vpop.eup %1518  ;;  %v1061_v19 = vadd.f32 1.0, %v1517_v14 }
 0x235   :  { %v998_v11 = vpop.xlane.xlu0 %997  ;;  %v1521_v23 = vpop.eup %1520  ;;  %v1060_v29 = vadd.f32 1.0, %v1519_v18  ;;  %v1168_v18 = vsub.s32 %v1165_v6, %v1952_v20 }
 0x236   :  { %v996_v10 = vpop.xlane.xlu1 %995  ;;  %v1351_v16 = vmul.f32 -1.442695, %v998_v11  ;;  %v1127_v44 = vrot.slane %v1521_v23, %v1126_v53  ;;  %v1175_v11 = vsub.s32 %v1172_v63, %v1952_v20  ;;  %v1193_v53 = vadd.s32 4294967208, %v1791_v54 }
 0x237   :  { %v1350_v12 = vmul.f32 -1.442695, %v996_v10 }
 0x238   :  { %v1196_v43 = vsub.s32 %v1193_v53, %v1952_v20 }
 0x239   :  { %1530 = vpow2.f32 %v1350_v12  ;;  %v1186_v12 = vadd.s32 4294967216, %v1791_v54 }
 0x23a   :  { %1532 = vpow2.f32 %v1349_v9  ;;  %v1179_v9 = vadd.s32 4294967224, %v1791_v54 }
 0x23b   :  { %1534 = vrcp.f32 %v1059_v15  ;;  %v1523_v26 = vpop.eup %1522 }
 0x23c   :  { %1536 = vpow2.f32 %v1351_v16  ;;  %v1525_v28 = vpop.eup %1524  ;;  %v1063_v39 = vadd.f32 1.0, %v1523_v26  ;;  %v1182_v23 = vsub.s32 %v1179_v9, %v1952_v20 }
 0x23d   :  { %v1002_v22 = vpop.xlane.xlu0 %1001  ;;  %1538 = vrcp.f32 %v1058_v17  ;;  %v1527_v30 = vpop.eup %1526  ;;  %v1062_v34 = vadd.f32 1.0, %v1525_v28 }
 0x23e   :  { %v1353_v24 = vmul.f32 -1.442695, %v1002_v22  ;;  %v1000_v25 = vpop.xlane.xlu1 %999  ;;  %1540 = vrcp.f32 %v1061_v19  ;;  %v1529_v35 = vpop.eup %1528  ;;  %v1122_v38 = vrot.slane %v1527_v30, %v1121_v36 }
 0x23f   :  { %v1352_v31 = vmul.f32 -1.442695, %v1000_v25  ;;  %v1134_v52 = vrot.slane %v1529_v35, %v1133_v33  ;;  %v1200_v25 = vadd.s32 4294967200, %v1791_v54 }
 0x240   :  { %v1129_v61 = vsel %vm1128_vm0, %v1127_v44, %v1122_v38  ;;  %v1207_v44 = vadd.s32 4294967192, %v1791_v54 }
 0x241   :  { %1542 = vpow2.f32 %v1352_v31  ;;  %v1136_v1 = vsel %vm1135_vm2, %v1134_v52, %v1129_v61  ;;  %v1203_v33 = vsub.s32 %v1200_v25, %v1952_v20 }
 0x242   :  { %1544 = vpow2.f32 %v1353_v24  ;;  %v1189_v24 = vsub.s32 %v1186_v12, %v1952_v20 }
 0x243   :  { %v1531_v57 = vpop.eup %1530  ;;  %1546 = vrcp.f32 %v1060_v29 }
 0x244   :  { %v1533_v42 = vpop.eup %1532  ;;  %1548 = vrcp.f32 %v1063_v39  ;;  %v1065_v48 = vadd.f32 1.0, %v1531_v57 }
 0x245   :  { %v1006_v37 = vpop.xlane.xlu0 %1005  ;;  %v1535_v51 = vpop.eup %1534  ;;  %1550 = vrcp.f32 %v1062_v34  ;;  %v1064_v55 = vadd.f32 1.0, %v1533_v42 }
 0x246   :  { %v1355_v49 = vmul.f32 -1.442695, %v1006_v37  ;;  %v1004_v50 = vpop.xlane.xlu1 %1003  ;;  %v1537_v56 = vpop.eup %1536  ;;  %v1148_v2 = vrot.slane %v1535_v51, %v1147_v46  ;;  %v1214_v46 = vadd.s32 4294967184, %v1791_v54  ;;  %v1221_v37 = vadd.s32 4294967176, %v1791_v54 }
 0x247   :  { %v1354_v40 = vmul.f32 -1.442695, %v1004_v50  ;;  %v1539_v58 = vpop.eup %1538  ;;  %v1066_v3 = vadd.f32 1.0, %v1537_v56  ;;  %v1210_v50 = vsub.s32 %v1207_v44, %v1952_v20 }
 0x248   :  { %1552 = vpow2.f32 %v1355_v49  ;;  %v1541_v60 = vpop.eup %1540  ;;  %v1141_v5 = vrot.slane %v1539_v58, %v1140_v41  ;;  %v1217_v52 = vsub.s32 %v1214_v46, %v1952_v20 }
 0x249   :  { %1554 = vpow2.f32 %v1354_v40  ;;  %v1162_v14 = vrot.slane %v1541_v60, %v1161_v62  ;;  %v1224_v40 = vsub.s32 %v1221_v37, %v1952_v20 }
 0x24a   :  { %1556 = vrcp.f32 %v1065_v48  ;;  %v1143_v10 = vsel %vm1142_vm7, %v1141_v5, %v1136_v1 }
 0x24b   :  { %v1543_v0 = vpop.eup %1542  ;;  %1558 = vrcp.f32 %v1064_v55  ;;  %v1150_v13 = vsel %vm1149_vm8, %v1148_v2, %v1143_v10 }
 0x24c   :  { %v1545_v4 = vpop.eup %1544  ;;  %v1067_v7 = vadd.f32 1.0, %v1543_v0 }
 0x24d   :  { %v1547_v8 = vpop.eup %1546  ;;  %v1068_v15 = vadd.f32 1.0, %v1545_v4 }
 0x24e   :  { %1560 = vrcp.f32 %v1067_v7  ;;  %v1549_v16 = vpop.eup %1548  ;;  %v1155_v17 = vrot.slane %v1547_v8, %v1154_v59 }
 0x24f   :  { %1562 = vrcp.f32 %v1066_v3  ;;  %v1551_v19 = vpop.eup %1550  ;;  %v1176_v29 = vrot.slane %v1549_v16, %v1175_v11 }
 0x250   :  { %v1157_v22 = vsel %vm1156_vm9, %v1155_v17, %v1150_v13  ;;  %1564 = vrcp.f32 %v1068_v15  ;;  %v1169_v30 = vrot.slane %v1551_v19, %v1168_v18 }
 0x251   :  { %v1164_v27 = vsel %vm1163_vm10, %v1162_v14, %v1157_v22 }
 0x252   :  { %v1553_v21 = vpop.eup %1552  ;;  %v1171_v36 = vsel %vm1170_vm11, %v1169_v30, %v1164_v27 }
 0x253   :  { %v1555_v26 = vpop.eup %1554  ;;  %v1070_v31 = vadd.f32 1.0, %v1553_v21  ;;  %v1178_v57 = vsel %vm1177_vm12, %v1176_v29, %v1171_v36 }
 0x254   :  { %v1557_v28 = vpop.eup %1556  ;;  %v1069_v32 = vadd.f32 1.0, %v1555_v26 }
 0x255   :  { %v1559_v35 = vpop.eup %1558  ;;  %1566 = vrcp.f32 %v1070_v31  ;;  %v1190_v39 = vrot.slane %v1557_v28, %v1189_v24 }
 0x256   :  { %1568 = vrcp.f32 %v1069_v32  ;;  %v1183_v42 = vrot.slane %v1559_v35, %v1182_v23 }
 0x258   :  { %v1561_v34 = vpop.eup %1560  ;;  %v1185_v47 = vsel %vm1184_vm13, %v1183_v42, %v1178_v57 }
 0x259   :  { %v1563_v45 = vpop.eup %1562  ;;  %v1192_v38 = vsel %vm1191_vm14, %v1190_v39, %v1185_v47  ;;  %v1204_v48 = vrot.slane %v1561_v34, %v1203_v33 }
 0x25a   :  { %v1197_v49 = vrot.slane %v1563_v45, %v1196_v43  ;;  %v1565_v51 = vpop.eup %1564 }
 0x25b   :  { %v1211_v59 = vrot.slane %v1565_v51, %v1210_v50 }
 0x25c   :  { %v1199_v55 = vsel %vm1198_vm15, %v1197_v49, %v1192_v38 }
 0x25d   :  { %v1206_v41 = vsel %vm1205_vm1, %v1204_v48, %v1199_v55 }
 0x25e   :  { %v1213_v60 = vsel %vm1212_vm3, %v1211_v59, %v1206_v41 }
 0x25f   :  { %v1567_v56 = vpop.eup %1566 }
 0x260   :  { %v1569_v58 = vpop.eup %1568  ;;  %v1225_v61 = vrot.slane %v1567_v56, %v1224_v40 }
 0x261   :  { %v1218_v54 = vrot.slane %v1569_v58, %v1217_v52 }
 0x263   :  { %v1220_v62 = vsel %vm1219_vm4, %v1218_v54, %v1213_v60 }
 0x264   :  { %v1227_v63 = vsel %vm1226_vm5, %v1225_v61, %v1220_v62 }
 0x265   :  { %1229 = vst [vmem:[#allocation2] sm:$0x1] %v1227_v63 }
 0x266   :  { %1581 = shalt.err (!%p1578_p4)
}
 0x267   :  { %s1582_s4 = scalar_lea.hbm %s2007_s5, 16 }
 0x268   :  { %p1583_p5 = scmp.ne.s32.totalorder %s2007_s5, %s1582_s4  ;;  %p1586_p6 = scmp.lt.u32.totalorder %s1582_s4, %s2007_s5 }
 0x26a   :  { %p1588_p7 = pnand %p1586_p6, %p1583_p5 }
 0x26c   :  { %1591 = shalt.err (!%p1588_p7)
}
 0x26d   :  { %1239 = dma.vmem_to_hbm [thread:$0]  %s1237_s2, 16, %s2007_s5, [#allocation3]  }
 0x26e   :  { %1592 = dma.done.wait [#allocation3], 16  }
 0x26f   :  { %1593 = vsyncadd [#allocation3], 4294967280 }
 0x270   :  { %1243 = vsyncpa [#allocation3], 1 }

</bundles_post_ra>
